<compile_context>
chip_gen: v7x
topology: tpu7x:2x2x1
jax: 0.10.0
libtpu: 0.0.40
codegen_flags: <defaults>
</compile_context>

<pallas_src>
import numpy as np
import jax
import jax.numpy as jnp
from jax.experimental import pallas as pl
from jax.experimental.pallas import tpu as pltpu

EPS = float(np.finfo(float).eps)  # np.finfo(float).eps, as in the torch code


def _net_kernel(nv_ref, p_ref, w_ref, nz_ref, o_ref):
    """One row-tile:  out = norm(relu(W_comb @ patches + noise_val * noise)).

    Shapes (per block):
      nv_ref : (1,)            SMEM scalar noise_val
      p_ref  : (K_pad, TR)     im2col patches, rows on lanes
      w_ref  : (F, K_pad)      fused (temp/2 | notemp@t=T-1) weights
      nz_ref : (F, TR)         pre-concatenated noise, rows on lanes
      o_ref  : (F, TR)         normalized activations (lane-dense store)
    """
    nv = nv_ref[0]
    y = jnp.dot(w_ref[...], p_ref[...], preferred_element_type=jnp.float32)
    y = jnp.maximum(y + nv * nz_ref[...], 0.0)
    denom = jnp.sum(y, axis=0, keepdims=True) + EPS          # sublane reduction
    o_ref[...] = y * pl.reciprocal(denom, approx=True)


def _im2col_T(x, kH, kW):
    """Transposed im2col for a valid conv3d whose temporal kernel spans T.

    x: (N, C, T, H, W) -> (C*T*kH*kW, N*OH*OW); column (row-of-K) order is
    (c, t, kh, kw), matching a flattened OIDHW weight; lane order is (n, oh, ow).
    """
    N, C, T, H, W = x.shape
    OH, OW = H - kH + 1, W - kW + 1
    rows = []
    for i in range(kH):
        cols = [x[:, :, :, i:i + OH, j:j + OW] for j in range(kW)]
        rows.append(jnp.stack(cols, axis=3))            # (N, C, T, kW, OH, OW)
    p = jnp.stack(rows, axis=3)                         # (N, C, T, kH, kW, OH, OW)
    p = jnp.transpose(p, (1, 2, 3, 4, 0, 5, 6))         # (C, T, kH, kW, N, OH, OW)
    return p.reshape(C * T * kH * kW, N * OH * OW)


@jax.jit
def net_forward(x, w_temp, w_notemp, noise_t, noise_nt, noise_val):
    """Pallas forward.  x: (N,C,T,H,W); w_temp: (Ft,C,T,kH,kW); w_notemp: (Fn,C,1,kH,kW)."""
    N, C, T, H, W = x.shape
    Ft, _, kT, kH, kW = w_temp.shape
    Fn, _, kTn, kHn, kWn = w_notemp.shape
    assert kT == T and kTn == 1 and (kH, kW) == (kHn, kWn), \
        "temporal kernel must span T and spatial kernels must match (needed for torch.cat)"
    OH, OW = H - kH + 1, W - kW + 1
    R = N * OH * OW
    F_total = Ft + Fn
    K = C * T * kH * kW

    # Tiling: rows (N*OH*OW) live on the lane axis -> pad to a multiple of 128,
    # tile at up to 512 lanes per grid step (bounded VMEM, double-buffered DMA).
    K_pad = pl.cdiv(K, 8) * 8
    TR = min(512, pl.cdiv(R, 128) * 128)
    R_pad = pl.cdiv(R, TR) * TR

    # --- glue (plain JAX, fused under jit): fused weights / patches / noise ---
    # Fused weight matrix (F_total, K): temp rows carry the /2, notemp rows are
    # scattered into the t = T-1 slice of the (c, t, kh, kw) column space.
    w_t_flat = w_temp.astype(jnp.float32).reshape(Ft, K) * 0.5
    w_n_embed = jnp.zeros((Fn, C, T, kH, kW), jnp.float32)
    w_n_embed = w_n_embed.at[:, :, T - 1].set(w_notemp[:, :, 0].astype(jnp.float32))
    w_comb = jnp.concatenate([w_t_flat, w_n_embed.reshape(Fn, K)], axis=0)
    w_comb = jnp.pad(w_comb, ((0, 0), (0, K_pad - K)))            # (F_total, K_pad)

    # Single im2col stream (the notemp conv reuses the same patches).
    pT = _im2col_T(x.astype(jnp.float32), kH, kW)                 # (K, R)
    pT = jnp.pad(pT, ((0, K_pad - K), (0, R_pad - R)))            # (K_pad, R_pad)

    # Pre-concatenated noise in the transposed (channels-on-sublanes) layout.
    nz = jnp.concatenate([noise_t, noise_nt], axis=1)[:, :, 0]    # (N, F_total, OH, OW)
    nzT = jnp.transpose(nz, (1, 0, 2, 3)).reshape(F_total, R).astype(jnp.float32)
    nzT = jnp.pad(nzT, ((0, 0), (0, R_pad - R)))                  # (F_total, R_pad)

    nv = jnp.asarray(noise_val, jnp.float32).reshape(1)           # SMEM scalar

    # --- hot path in Pallas -----------------------------------------------------
    out_T = pl.pallas_call(
        _net_kernel,
        out_shape=jax.ShapeDtypeStruct((F_total, R_pad), jnp.float32),
        grid=(R_pad // TR,),
        in_specs=[
            pl.BlockSpec(memory_space=pltpu.MemorySpace.SMEM),        # noise_val
            pl.BlockSpec((K_pad, TR), lambda i: (0, i)),              # patches
            pl.BlockSpec((F_total, K_pad), lambda i: (0, 0)),         # fused weights
            pl.BlockSpec((F_total, TR), lambda i: (0, i)),            # noise
        ],
        out_specs=pl.BlockSpec((F_total, TR), lambda i: (0, i)),
        compiler_params=pltpu.CompilerParams(
            dimension_semantics=("parallel",)),
    )(nv, pT, w_comb, nzT)

    # back to NCDHW: (N, F_total, 1, OH, OW)
    out = out_T[:, :R].reshape(F_total, N, OH, OW)
    out = jnp.transpose(out, (1, 0, 2, 3))[:, :, None, :, :]
    return out


def reference_forward(x, w_temp, w_notemp, noise_t, noise_nt, noise_val):
    """Plain-JAX reference mirroring the torch forward exactly."""
    dn = ("NCDHW", "OIDHW", "NCDHW")
    x_temp = jax.lax.conv_general_dilated(
        x, w_temp, (1, 1, 1), "VALID", dimension_numbers=dn) / 2
    x_temp = jax.nn.relu(x_temp + noise_val * noise_t)
    x_last = x[:, :, -1:, :, :]
    x_notemp = jax.lax.conv_general_dilated(
        x_last, w_notemp, (1, 1, 1), "VALID", dimension_numbers=dn)
    x_notemp = jax.nn.relu(x_notemp + noise_val * noise_nt)
    cat = jnp.concatenate([x_temp, x_notemp], axis=1)
    return cat / (jnp.sum(cat, axis=1, keepdims=True) + EPS)


if __name__ == "__main__":
    key = jax.random.PRNGKey(0)
    kx, kwt, kwn, knt, knn = jax.random.split(key, 5)

    # small shapes consistent with the module's forward
    N, C, T, H, W = 2, 3, 4, 16, 16
    Ft, Fn, kH, kW = 4, 4, 5, 5
    noise_val = 0.1
    num_rfs = 3  # only used for corr_x/corr_y in torch code, never returned (dead code)
    OH, OW = H - kH + 1, W - kW + 1

    x = jax.random.normal(kx, (N, C, T, H, W), jnp.float32)
    # Parameters correspond to nn.Parameter(torch.from_numpy(filters_*).permute(1,0,2,3,4)):
    # stored here directly in conv3d OIDHW layout, deterministically initialized.
    w_temp = 0.1 * jax.random.normal(kwt, (Ft, C, T, kH, kW), jnp.float32)
    w_notemp = 0.1 * jax.random.normal(kwn, (Fn, C, 1, kH, kW), jnp.float32)
    # Deterministic stand-in for the torch forward's np.random.randn noise tensors.
    noise_t = jax.random.normal(knt, (N, Ft, 1, OH, OW), jnp.float32)
    noise_nt = jax.random.normal(knn, (N, Fn, 1, OH, OW), jnp.float32)

    out = net_forward(x, w_temp, w_notemp, noise_t, noise_nt, noise_val)
    out = jax.block_until_ready(out)

    ref = reference_forward(x, w_temp, w_notemp, noise_t, noise_nt, noise_val)
    assert out.shape == (N, Ft + Fn, 1, OH, OW)
    np.testing.assert_allclose(np.asarray(out), np.asarray(ref), atol=5e-3, rtol=5e-3)

    print("KERNEL_OK")
</pallas_src>

<mosaic_0001>
module attributes {stable_mosaic.version = 11 : i64} {
  func.func @_net_kernel(%arg0: i32, %arg1: memref<1xf32, #tpu.memory_space<smem>>, %arg2: memref<304x384xf32, #tpu.memory_space<vmem>>, %arg3: memref<8x304xf32, #tpu.memory_space<vmem>>, %arg4: memref<8x384xf32, #tpu.memory_space<vmem>>, %arg5: memref<8x384xf32, #tpu.memory_space<vmem>>) attributes {dimension_semantics = [#tpu.dimension_semantics<parallel>], iteration_bounds = array<i64: 1>, scalar_prefetch = 0 : i64, scratch_operands = 0 : i64, tpu.core_type = #tpu.core_type<tc>, window_params = [{transform_indices = @transform_0, window_bounds = array<i64: 1>}, {transform_indices = @transform_1, window_bounds = array<i64: 304, 384>}, {pipeline_mode = #tpu.pipeline_mode<synchronous>, transform_indices = @transform_2, window_bounds = array<i64: 8, 304>}, {transform_indices = @transform_3, window_bounds = array<i64: 8, 384>}, {transform_indices = @transform_4, window_bounds = array<i64: 8, 384>}]} {
    %c0 = arith.constant 0 : index
    %0 = memref.load %arg1[%c0] : memref<1xf32, #tpu.memory_space<smem>>
    %c0_0 = arith.constant 0 : index
    %c0_1 = arith.constant 0 : index
    %1 = vector.load %arg3[%c0_0, %c0_1] : memref<8x304xf32, #tpu.memory_space<vmem>>, vector<8x304xf32>
    %c0_2 = arith.constant 0 : index
    %c0_3 = arith.constant 0 : index
    %2 = vector.load %arg2[%c0_2, %c0_3] : memref<304x384xf32, #tpu.memory_space<vmem>>, vector<304x384xf32>
    %cst = arith.constant dense<0.000000e+00> : vector<8x384xf32>
    %3 = tpu.matmul %1, %2, %cst {dimension_numbers = #tpu.dot_dimension_numbers<[1], [0], [0], [1], [0, 0, 1, 1], [], []>} : vector<8x304xf32>, vector<304x384xf32>, vector<8x384xf32> -> vector<8x384xf32>
    %c0_4 = arith.constant 0 : index
    %c0_5 = arith.constant 0 : index
    %4 = vector.load %arg4[%c0_4, %c0_5] : memref<8x384xf32, #tpu.memory_space<vmem>>, vector<8x384xf32>
    %5 = vector.broadcast %0 : f32 to vector<8x384xf32>
    %6 = arith.mulf %5, %4 : vector<8x384xf32>
    %7 = arith.addf %3, %6 : vector<8x384xf32>
    %cst_6 = arith.constant 0.000000e+00 : f32
    %8 = vector.broadcast %cst_6 : f32 to vector<8x384xf32>
    %9 = arith.maximumf %7, %8 : vector<8x384xf32>
    %cst_7 = arith.constant dense<0.000000e+00> : vector<384xf32>
    %10 = vector.multi_reduction <add>, %9, %cst_7 [0] : vector<8x384xf32> to vector<384xf32>
    %11 = vector.shape_cast %10 : vector<384xf32> to vector<1x384xf32>
    %cst_8 = arith.constant 2.22044605E-16 : f32
    %12 = vector.broadcast %cst_8 : f32 to vector<1x384xf32>
    %13 = arith.addf %11, %12 : vector<1x384xf32>
    %14 = tpu.reciprocal %13 {approx = true} : vector<1x384xf32> -> vector<1x384xf32>
    %15 = vector.broadcast %14 : vector<1x384xf32> to vector<8x384xf32>
    %16 = arith.mulf %9, %15 : vector<8x384xf32>
    %c0_9 = arith.constant 0 : index
    %c0_10 = arith.constant 0 : index
    %17 = vector.load %arg5[%c0_9, %c0_10] : memref<8x384xf32, #tpu.memory_space<vmem>>, vector<8x384xf32>
    tpu.vector_store %arg5[%c0_9, %c0_10], %16 {strides = array<i32>} : memref<8x384xf32, #tpu.memory_space<vmem>>, vector<8x384xf32>,
    return
  }
  func.func @transform_0(%arg0: i32) -> i32 {
    %c0_i32 = arith.constant 0 : i32
    %c0_i32_0 = arith.constant 0 : i32
    return %c0_i32 : i32
  }
  func.func @transform_1(%arg0: i32) -> (i32, i32) {
    %c0_i32 = arith.constant 0 : i32
    %c0_i32_0 = arith.constant 0 : i32
    return %c0_i32, %arg0 : i32, i32
  }
  func.func @transform_2(%arg0: i32) -> (i32, i32) {
    %c0_i32 = arith.constant 0 : i32
    %c0_i32_0 = arith.constant 0 : i32
    %c0_i32_1 = arith.constant 0 : i32
    return %c0_i32, %c0_i32_0 : i32, i32
  }
  func.func @transform_3(%arg0: i32) -> (i32, i32) {
    %c0_i32 = arith.constant 0 : i32
    %c0_i32_0 = arith.constant 0 : i32
    return %c0_i32, %arg0 : i32, i32
  }
  func.func @transform_4(%arg0: i32) -> (i32, i32) {
    %c0_i32 = arith.constant 0 : i32
    %c0_i32_0 = arith.constant 0 : i32
    return %c0_i32, %arg0 : i32, i32
  }
}

</mosaic_0001>

<bundles_post_ra>
// kernel: net_forward.1
= control target key start
LH: loop header
LB: loop body
LE: loop exit
PB: predicated region body
PF: predicated region fallthrough
CT: control target
= control target key end

     0   :  { %v655_v3 = vmov 0.0   ;;  %vm143_vm0 = vcmask 392192   ;;  %vm657_vm1 = vmmov 0   ;;  %s1063_s1 = inlined_call_operand.vmem [shape: f32[304,384], index: 1, kind: input, shape index: {}]   ;;  %s1064_s2 = inlined_call_operand.vmem [shape: f32[8,304], index: 2, kind: input, shape index: {}]   ;;  %s1065_s0 = inlined_call_operand.<no memory space> [shape: f32[1], index: 0, kind: input, shape index: {}]   ;;  %s1066_s3 = inlined_call_operand.vmem [shape: f32[8,384], index: 3, kind: input, shape index: {}]   ;;  %s1067_s4 = inlined_call_operand.vmem [shape: f32[8,384], index: 4, kind: output, shape index: {}]  }
   0x1   :  { %v23_v0 = vld [vmem:[%s1063_s1 + $0x8] sm:$0xff]  ;;  %v26_v1 = vld [vmem:[%s1063_s1 + $0x20] sm:$0xff]  ;;  %282 = vmatprep.mubr.f32.mxu1 %v655_v3  ;;  %v25_v7 = vld [vmem:[%s1063_s1 + $0x18] sm:$0xff] }
   0x2   :  { %v119_v2 = vld [vmem:[%s1063_s1 + $0x308] sm:$0xff]  ;;  %v525_v4 = vpack.c.bf16 %v26_v1, %v23_v0  ;;  %v122_v5 = vld [vmem:[%s1063_s1 + $0x320] sm:$0xff]  ;;  %v121_v11 = vld [vmem:[%s1063_s1 + $0x318] sm:$0xff] }
   0x3   :  { %v22_v6 = vld [vmem:[%s1063_s1] sm:$0xff]  ;;  %v589_v8 = vpack.c.bf16 %v122_v5, %v119_v2  ;;  %v29_v12 = vld [vmem:[%s1063_s1 + $0x38] sm:$0xff]  ;;  %v32_v14 = vld [vmem:[%s1063_s1 + $0x50] sm:$0xff] }
   0x4   :  { %v527_v9 = vpack.c.bf16 %v25_v7, %v22_v6  ;;  %v118_v10 = vld [vmem:[%s1063_s1 + $0x300] sm:$0xff]  ;;  %526 = vmatprep.subr.bf16.mxu0 %v525_v4  ;;  %v125_v15 = vld [vmem:[%s1063_s1 + $0x338] sm:$0xff]  ;;  %v128_v16 = vld [vmem:[%s1063_s1 + $0x350] sm:$0xff]  ;;  %v529_v17 = vpack.c.bf16 %v32_v14, %v29_v12 }
   0x5   :  { %v591_v13 = vpack.c.bf16 %v121_v11, %v118_v10  ;;  %590 = vmatprep.subr.bf16.mxu1 %v589_v8  ;;  %v593_v18 = vpack.c.bf16 %v128_v16, %v125_v15  ;;  %v28_v19 = vld [vmem:[%s1063_s1 + $0x30] sm:$0xff]  ;;  %v31_v20 = vld [vmem:[%s1063_s1 + $0x48] sm:$0xff]  ;;  %v38_v25 = vld [vmem:[%s1063_s1 + $0x80] sm:$0xff] }
   0x6   :  { %528 = vmatpush1.bf16.msra.mxu0 %v527_v9  ;;  %v124_v21 = vld [vmem:[%s1063_s1 + $0x330] sm:$0xff]  ;;  %v531_v22 = vpack.c.bf16 %v31_v20, %v28_v19  ;;  %v127_v23 = vld [vmem:[%s1063_s1 + $0x348] sm:$0xff]  ;;  %v134_v29 = vld [vmem:[%s1063_s1 + $0x380] sm:$0xff] }
   0x7   :  { %592 = vmatpush1.bf16.msra.mxu1 %v591_v13  ;;  %v35_v24 = vld [vmem:[%s1063_s1 + $0x68] sm:$0xff]  ;;  %530 = vmatprep.subr.bf16.mxu0 %v529_v17  ;;  %v595_v26 = vpack.c.bf16 %v127_v23, %v124_v21  ;;  %v34_v30 = vld [vmem:[%s1063_s1 + $0x60] sm:$0xff]  ;;  %v37_v32 = vld [vmem:[%s1063_s1 + $0x78] sm:$0xff] }
   0x8   :  { %594 = vmatprep.subr.bf16.mxu1 %v593_v18  ;;  %v533_v27 = vpack.c.bf16 %v38_v25, %v35_v24  ;;  %v131_v28 = vld [vmem:[%s1063_s1 + $0x368] sm:$0xff]  ;;  %v130_v33 = vld [vmem:[%s1063_s1 + $0x360] sm:$0xff]  ;;  %v133_v34 = vld [vmem:[%s1063_s1 + $0x378] sm:$0xff]  ;;  %v535_v35 = vpack.c.bf16 %v37_v32, %v34_v30 }
   0x9   :  { %v597_v31 = vpack.c.bf16 %v134_v29, %v131_v28  ;;  %v41_v36 = vld [vmem:[%s1063_s1 + $0x98] sm:$0xff]  ;;  %v44_v37 = vld [vmem:[%s1063_s1 + $0xb0] sm:$0xff]  ;;  %v599_v39 = vpack.c.bf16 %v133_v34, %v130_v33  ;;  %v75_v41 = vld [vmem:[%s1063_s1 + $0x1a8] sm:$0xff] }
   0xa   :  { %532 = vmatpush1.bf16.msra.mxu0 %v531_v22  ;;  %v72_v38 = vld [vmem:[%s1063_s1 + $0x190] sm:$0xff]  ;;  %v537_v40 = vpack.c.bf16 %v44_v37, %v41_v36  ;;  %v43_v43 = vld [vmem:[%s1063_s1 + $0xa8] sm:$0xff]  ;;  %v50_v48 = vld [vmem:[%s1063_s1 + $0xe0] sm:$0xff] }
   0xb   :  { %596 = vmatpush1.bf16.msra.mxu1 %v595_v26  ;;  %534 = vmatprep.subr.bf16.mxu0 %v533_v27  ;;  %v40_v42 = vld [vmem:[%s1063_s1 + $0x90] sm:$0xff]  ;;  %v601_v44 = vpack.c.bf16 %v75_v41, %v72_v38  ;;  %v27_v46 = vld [vmem:[%s1063_s1 + $0x28] sm:$0xff]  ;;  %v78_v49 = vld [vmem:[%s1063_s1 + $0x1c0] sm:$0xff] }
   0xc   :  { %598 = vmatprep.subr.bf16.mxu1 %v597_v31  ;;  %v24_v45 = vld [vmem:[%s1063_s1 + $0x10] sm:$0xff]  ;;  %v47_v47 = vld [vmem:[%s1063_s1 + $0xc8] sm:$0xff]  ;;  %v539_v50 = vpack.c.bf16 %v43_v43, %v40_v42  ;;  %v81_v52 = vld [vmem:[%s1063_s1 + $0x1d8] sm:$0xff] }
   0xd   :  { %v792_v51 = vld [vmem:[%s1064_s2 + $0x10] sm:$0xff]  ;;  %v603_v53 = vpack.c.bf16 %v27_v46, %v24_v45  ;;  %v541_v54 = vpack.c.bf16 %v50_v48, %v47_v47  ;;  %v46_v55 = vld [vmem:[%s1063_s1 + $0xc0] sm:$0xff]  ;;  %v49_v56 = vld [vmem:[%s1063_s1 + $0xd8] sm:$0xff]  ;;  %v605_v58 = vpack.c.bf16 %v81_v52, %v78_v49 }
   0xe   :  { %536 = vmatpush1.bf16.msra.mxu0 %v535_v35  ;;  %v30_v57 = vld [vmem:[%s1063_s1 + $0x40] sm:$0xff]  ;;  %v33_v59 = vld [vmem:[%s1063_s1 + $0x58] sm:$0xff]  ;;  %v56_v61 = vld [vmem:[%s1063_s1 + $0x110] sm:$0xff]  ;;  %v543_v0 = vpack.c.bf16 %v49_v56, %v46_v55 }
   0xf   :  { %600 = vmatpush1.bf16.msra.mxu1 %v599_v39  ;;  %538 = vmatprep.subr.bf16.mxu0 %v537_v40  ;;  %v53_v60 = vld [vmem:[%s1063_s1 + $0xf8] sm:$0xff]  ;;  %v84_v62 = vld [vmem:[%s1063_s1 + $0x1f0] sm:$0xff]  ;;  %v87_v63 = vld [vmem:[%s1063_s1 + $0x208] sm:$0xff]  ;;  %v607_v1 = vpack.c.bf16 %v33_v59, %v30_v57 }
  0x10   :  { %602 = vmatprep.subr.bf16.mxu1 %v601_v44  ;;  %v545_v2 = vpack.c.bf16 %v56_v61, %v53_v60  ;;  %v52_v4 = vld [vmem:[%s1063_s1 + $0xf0] sm:$0xff]  ;;  %v55_v5 = vld [vmem:[%s1063_s1 + $0x108] sm:$0xff]  ;;  %v609_v7 = vpack.c.bf16 %v87_v63, %v84_v62  ;;  %v62_v10 = vld [vmem:[%s1063_s1 + $0x140] sm:$0xff] }
  0x11   :  { %v36_v6 = vld [vmem:[%s1063_s1 + $0x70] sm:$0xff]  ;;  %v39_v8 = vld [vmem:[%s1063_s1 + $0x88] sm:$0xff]  ;;  %v90_v11 = vld [vmem:[%s1063_s1 + $0x220] sm:$0xff]  ;;  %v547_v13 = vpack.c.bf16 %v55_v5, %v52_v4 }
  0x12   :  { %540 = vmatpush1.bf16.msra.mxu0 %v539_v50  ;;  %466 = vmatmul.mubr.msk.f32.vlgmr.msra.gmra.mrb[0].mxu1 %vm143_vm0, %v792_v51  ;;  %v59_v9 = vld [vmem:[%s1063_s1 + $0x128] sm:$0xff]  ;;  %v93_v12 = vld [vmem:[%s1063_s1 + $0x238] sm:$0xff]  ;;  %v611_v14 = vpack.c.bf16 %v39_v8, %v36_v6  ;;  %v58_v16 = vld [vmem:[%s1063_s1 + $0x120] sm:$0xff] }
  0x13   :  { %604 = vmatpush3.bf16.msra.mxu1 %v603_v53  ;;  %542 = vmatprep.subr.bf16.mxu0 %v541_v54  ;;  %v549_v15 = vpack.c.bf16 %v62_v10, %v59_v9  ;;  %v61_v17 = vld [vmem:[%s1063_s1 + $0x138] sm:$0xff]  ;;  %v42_v18 = vld [vmem:[%s1063_s1 + $0xa0] sm:$0xff]  ;;  %v613_v19 = vpack.c.bf16 %v93_v12, %v90_v11  ;;  %v68_v22 = vld [vmem:[%s1063_s1 + $0x170] sm:$0xff] }
  0x14   :  { %606 = vmatprep.subr.bf16.mxu1 %v605_v58  ;;  %v45_v20 = vld [vmem:[%s1063_s1 + $0xb8] sm:$0xff]  ;;  %v96_v23 = vld [vmem:[%s1063_s1 + $0x250] sm:$0xff]  ;;  %v99_v24 = vld [vmem:[%s1063_s1 + $0x268] sm:$0xff]  ;;  %v551_v25 = vpack.c.bf16 %v61_v17, %v58_v16 }
  0x15   :  { %v65_v21 = vld [vmem:[%s1063_s1 + $0x158] sm:$0xff]  ;;  %v615_v26 = vpack.c.bf16 %v45_v20, %v42_v18  ;;  %v64_v28 = vld [vmem:[%s1063_s1 + $0x150] sm:$0xff]  ;;  %v67_v29 = vld [vmem:[%s1063_s1 + $0x168] sm:$0xff]  ;;  %v617_v31 = vpack.c.bf16 %v99_v24, %v96_v23 }
  0x16   :  { %544 = vmatpush1.bf16.msra.mxu0 %v543_v0  ;;  %v553_v27 = vpack.c.bf16 %v68_v22, %v65_v21  ;;  %v48_v30 = vld [vmem:[%s1063_s1 + $0xd0] sm:$0xff]  ;;  %v51_v32 = vld [vmem:[%s1063_s1 + $0xe8] sm:$0xff]  ;;  %v74_v34 = vld [vmem:[%s1063_s1 + $0x1a0] sm:$0xff]  ;;  %v555_v37 = vpack.c.bf16 %v67_v29, %v64_v28 }
  0x17   :  { %608 = vmatpush3.bf16.msra.mxu1 %v607_v1  ;;  %546 = vmatprep.subr.bf16.mxu0 %v545_v2  ;;  %v71_v33 = vld [vmem:[%s1063_s1 + $0x188] sm:$0xff]  ;;  %v102_v35 = vld [vmem:[%s1063_s1 + $0x280] sm:$0xff]  ;;  %v105_v36 = vld [vmem:[%s1063_s1 + $0x298] sm:$0xff]  ;;  %v619_v39 = vpack.c.bf16 %v51_v32, %v48_v30 }
  0x18   :  { %610 = vmatprep.subr.bf16.mxu1 %v609_v7  ;;  %v70_v38 = vld [vmem:[%s1063_s1 + $0x180] sm:$0xff]  ;;  %v557_v40 = vpack.c.bf16 %v74_v34, %v71_v33  ;;  %v73_v41 = vld [vmem:[%s1063_s1 + $0x198] sm:$0xff]  ;;  %v621_v44 = vpack.c.bf16 %v105_v36, %v102_v35  ;;  %v80_v46 = vld [vmem:[%s1063_s1 + $0x1d0] sm:$0xff] }
  0x19   :  { %v54_v42 = vld [vmem:[%s1063_s1 + $0x100] sm:$0xff]  ;;  %v57_v43 = vld [vmem:[%s1063_s1 + $0x118] sm:$0xff]  ;;  %v20_v47 = vld [vmem:[%s1064_s2 + $0x8] sm:$0xff]  ;;  %v559_v50 = vpack.c.bf16 %v73_v41, %v70_v38 }
  0x1a   :  { %548 = vmatpush1.bf16.msra.mxu0 %v547_v13  ;;  %v77_v45 = vld [vmem:[%s1063_s1 + $0x1b8] sm:$0xff]  ;;  %v108_v48 = vld [vmem:[%s1063_s1 + $0x2b0] sm:$0xff]  ;;  %v111_v49 = vld [vmem:[%s1063_s1 + $0x2c8] sm:$0xff]  ;;  %353 = vmatprep.mubr.f32.mxu1 %v20_v47  ;;  %v623_v52 = vpack.c.bf16 %v57_v43, %v54_v42 }
  0x1b   :  { %612 = vmatpush3.bf16.msra.mxu1 %v611_v14  ;;  %550 = vmatprep.subr.bf16.mxu0 %v549_v15  ;;  %v561_v53 = vpack.c.bf16 %v80_v46, %v77_v45  ;;  %v76_v54 = vld [vmem:[%s1063_s1 + $0x1b0] sm:$0xff]  ;;  %v79_v55 = vld [vmem:[%s1063_s1 + $0x1c8] sm:$0xff]  ;;  %v625_v57 = vpack.c.bf16 %v111_v49, %v108_v48  ;;  %v86_v60 = vld [vmem:[%s1063_s1 + $0x200] sm:$0xff] }
  0x1c   :  { %614 = vmatprep.subr.bf16.mxu1 %v613_v19  ;;  %211 = vmatprep.mubr.f32.mxu0 %v20_v47  ;;  %v60_v56 = vld [vmem:[%s1063_s1 + $0x130] sm:$0xff]  ;;  %v63_v58 = vld [vmem:[%s1063_s1 + $0x148] sm:$0xff]  ;;  %v114_v61 = vld [vmem:[%s1063_s1 + $0x2e0] sm:$0xff]  ;;  %v563_v63 = vpack.c.bf16 %v79_v55, %v76_v54 }
  0x1d   :  { %v83_v59 = vld [vmem:[%s1063_s1 + $0x1e8] sm:$0xff]  ;;  %v117_v62 = vld [vmem:[%s1063_s1 + $0x2f8] sm:$0xff]  ;;  %v627_v0 = vpack.c.bf16 %v63_v58, %v60_v56  ;;  %v82_v2 = vld [vmem:[%s1063_s1 + $0x1e0] sm:$0xff] }
  0x1e   :  { %552 = vmatpush1.bf16.msra.mxu0 %v551_v25  ;;  %v565_v1 = vpack.c.bf16 %v86_v60, %v83_v59  ;;  %v85_v4 = vld [vmem:[%s1063_s1 + $0x1f8] sm:$0xff]  ;;  %v66_v5 = vld [vmem:[%s1063_s1 + $0x160] sm:$0xff]  ;;  %v629_v6 = vpack.c.bf16 %v117_v62, %v114_v61  ;;  %v92_v9 = vld [vmem:[%s1063_s1 + $0x230] sm:$0xff] }
  0x1f   :  { %616 = vmatpush3.bf16.msra.mxu1 %v615_v26  ;;  %554 = vmatprep.subr.bf16.mxu0 %v553_v27  ;;  %v69_v7 = vld [vmem:[%s1063_s1 + $0x178] sm:$0xff]  ;;  %v567_v10 = vpack.c.bf16 %v85_v4, %v82_v2  ;;  %v88_v13 = vld [vmem:[%s1063_s1 + $0x210] sm:$0xff]  ;;  %v91_v14 = vld [vmem:[%s1063_s1 + $0x228] sm:$0xff]  ;;  %v656_v26 = vmov 0.0|0.0  }
  0x20   :  { %618 = vmatprep.subr.bf16.mxu1 %v617_v31  ;;  %v89_v8 = vld [vmem:[%s1063_s1 + $0x218] sm:$0xff]  ;;  %v631_v11 = vpack.c.bf16 %v69_v7, %v66_v5  ;;  %v120_v15 = vld [vmem:[%s1063_s1 + $0x310] sm:$0xff]  ;;  %v123_v16 = vld [vmem:[%s1063_s1 + $0x328] sm:$0xff]  ;;  %v571_v19 = vpack.c.bf16 %v91_v14, %v88_v13 }
  0x21   :  { %v569_v12 = vpack.c.bf16 %v92_v9, %v89_v8  ;;  %v95_v17 = vld [vmem:[%s1063_s1 + $0x248] sm:$0xff]  ;;  %v98_v18 = vld [vmem:[%s1063_s1 + $0x260] sm:$0xff]  ;;  %v634_v21 = vpack.c.bf16 %v123_v16, %v120_v15  ;;  %v97_v24 = vld [vmem:[%s1063_s1 + $0x258] sm:$0xff] }
  0x22   :  { %556 = vmatpush1.bf16.msra.mxu0 %v555_v37  ;;  %v19_v20 = vld [vmem:[%s1064_s2] sm:$0xff]  ;;  %v573_v22 = vpack.c.bf16 %v98_v18, %v95_v17  ;;  %v129_v27 = vld [vmem:[%s1063_s1 + $0x358] sm:$0xff]  ;;  %v104_v29 = vld [vmem:[%s1063_s1 + $0x290] sm:$0xff] }
  0x23   :  { %620 = vmatpush3.bf16.msra.mxu1 %v619_v39  ;;  %558 = vmatprep.subr.bf16.mxu0 %v557_v40  ;;  %v94_v23 = vld [vmem:[%s1063_s1 + $0x240] sm:$0xff]  ;;  %v101_v28 = vld [vmem:[%s1063_s1 + $0x278] sm:$0xff]  ;;  %v100_v33 = vld [vmem:[%s1063_s1 + $0x270] sm:$0xff] }
  0x24   :  { %622 = vmatprep.subr.bf16.mxu1 %v621_v44  ;;  %v126_v25 = vld [vmem:[%s1063_s1 + $0x340] sm:$0xff]  ;;  %v575_v30 = vpack.c.bf16 %v97_v24, %v94_v23  ;;  %v577_v32 = vpack.c.bf16 %v104_v29, %v101_v28  ;;  %v103_v34 = vld [vmem:[%s1063_s1 + $0x288] sm:$0xff]  ;;  %v132_v35 = vld [vmem:[%s1063_s1 + $0x370] sm:$0xff] }
  0x25   :  { %v637_v31 = vpack.c.bf16 %v129_v27, %v126_v25  ;;  %v135_v36 = vld [vmem:[%s1063_s1 + $0x388] sm:$0xff]  ;;  %v110_v38 = vld [vmem:[%s1063_s1 + $0x2c0] sm:$0xff]  ;;  %v579_v39 = vpack.c.bf16 %v103_v34, %v100_v33  ;;  %v113_v43 = vld [vmem:[%s1063_s1 + $0x2d8] sm:$0xff] }
  0x26   :  { %560 = vmatpush1.bf16.msra.mxu0 %v559_v50  ;;  %v107_v37 = vld [vmem:[%s1063_s1 + $0x2a8] sm:$0xff]  ;;  %v640_v40 = vpack.c.bf16 %v135_v36, %v132_v35  ;;  %v106_v42 = vld [vmem:[%s1063_s1 + $0x2a0] sm:$0xff]  ;;  %v116_v44 = vld [vmem:[%s1063_s1 + $0x2f0] sm:$0xff] }
  0x27   :  { %624 = vmatpush3.bf16.msra.mxu1 %v623_v52  ;;  %562 = vmatprep.subr.bf16.mxu0 %v561_v53  ;;  %v581_v41 = vpack.c.bf16 %v110_v38, %v107_v37  ;;  %v585_v46 = vpack.c.bf16 %v116_v44, %v113_v43  ;;  %v112_v47 = vld [vmem:[%s1063_s1 + $0x2d0] sm:$0xff]  ;;  %v115_v48 = vld [vmem:[%s1063_s1 + $0x2e8] sm:$0xff]  ;;  %v136_v61 = vld [vmem:[%s1066_s3] sm:$0xff] }
  0x28   :  { %626 = vmatprep.subr.bf16.mxu1 %v625_v57  ;;  %v587_v49 = vpack.c.bf16 %v115_v48, %v112_v47  ;;  %v138_v56 = vld [vmem:[%s1066_s3 + $0x10] sm:$0xff]  ;;  %v139_v57 = vstv %s1065_s0 }
  0x29   :  { %v142_v58 = vmul.f32 %v139_v57, %v138_v56 }
  0x2a   :  { %564 = vmatpush1.bf16.msra.mxu0 %v563_v63  ;;  %v137_v63 = vld [vmem:[%s1066_s3 + $0x8] sm:$0xff] }
  0x2b   :  { %628 = vmatpush3.bf16.msra.mxu1 %v627_v0  ;;  %566 = vmatprep.subr.bf16.mxu0 %v565_v1  ;;  %v140_v1 = vmul.f32 %v139_v57, %v136_v61  ;;  %v141_v4 = vmul.f32 %v139_v57, %v137_v63 }
  0x2c   :  { %630 = vmatprep.subr.bf16.mxu1 %v629_v6 }
  0x2e   :  { %568 = vmatpush1.bf16.msra.mxu0 %v567_v10 }
  0x2f   :  { %632 = vmatpush3.bf16.msra.mxu1 %v631_v11  ;;  %570 = vmatprep.subr.bf16.mxu0 %v569_v12 }
  0x30   :  { %633 = vmatprep.subr.bf16.mxu1 %v656_v26 }
  0x32   :  { %572 = vmatpush1.bf16.msra.mxu0 %v571_v19  ;;  %354 = vmatmul.mubr.f32.vlgmr.msra.gmra.mrb[2].mxu1 %v19_v20 }
  0x33   :  { %635 = vmatpush3.bf16.msra.mxu1 %v634_v21  ;;  %574 = vmatprep.subr.bf16.mxu0 %v573_v22 }
  0x34   :  { %636 = vmatprep.subr.bf16.mxu1 %v656_v26  ;;  %522 = vmatprep.mubr.msk.f32.mxu1 %vm657_vm1, %v655_v3  ;;  %v109_v3 = vld [vmem:[%s1063_s1 + $0x2b8] sm:$0xff] }
  0x35   :  { %v583_v45 = vpack.c.bf16 %v109_v3, %v106_v42 }
  0x36   :  { %576 = vmatpush1.bf16.msra.mxu0 %v575_v30 }
  0x37   :  { %638 = vmatpush3.bf16.msra.mxu1 %v637_v31  ;;  %578 = vmatprep.subr.bf16.mxu0 %v577_v32 }
  0x38   :  { %639 = vmatprep.subr.bf16.mxu1 %v656_v26 }
  0x3a   :  { %580 = vmatpush1.bf16.msra.mxu0 %v579_v39 }
  0x3b   :  { %641 = vmatpush3.bf16.msra.mxu1 %v640_v40  ;;  %582 = vmatprep.subr.bf16.mxu0 %v581_v41 }
  0x3e   :  { %523 = vmatmul.mubr.msk.f32.vlgmr.msra.gmra.mrb[4].mxu1 %vm143_vm0, %v792_v51  ;;  %584 = vmatpush1.bf16.msra.mxu0 %v583_v45 }
  0x3f   :  { %586 = vmatprep.subr.bf16.mxu0 %v585_v46 }
  0x42   :  { %588 = vmatpush1.bf16.msra.mxu0 %v587_v49 }
  0x45   :  { %212 = vmatmul.mubr.f32.vlgmr.msra.gmra.mrb[0].mxu0 %v19_v20 }
  0xe5   :  { %v284_v50 = vpop.f32.mrb[0].mxu1 }
  0xe6   :  { %v286_v52 = vpop.f32.mrb[1].mxu1 }
 0x105   :  { %v500_v53 = vpop.f32.mrb[2].mxu1 }
 0x106   :  { %v501_v54 = vpop.f32.mrb[3].mxu1 }
 0x107   :  { %v502_v55 = vadd.f32 %v501_v54, %v500_v53 }
 0x109   :  { %v356_v51 = vadd.f32 %v502_v55, %v142_v58 }
 0x111   :  { %v425_v59 = vpop.f32.mrb[4].mxu1 }
 0x112   :  { %v426_v60 = vadd.f32 %v425_v59, %v356_v51  ;;  %v524_v62 = vpop.f32.mrb[5].mxu1 }
 0x114   :  { %v431_v0 = vmax.f32 %v426_v60, 0.0 }
 0x116   :  { %v444_v2 = vrot.slane %v431_v0, 4 }
 0x118   :  { %v445_v5 = vadd.f32 %v444_v2, %v431_v0  ;;  %v213_v6 = vpop.f32.mrb[0].mxu0 }
 0x119   :  { %v214_v7 = vadd.f32 %v213_v6, %v140_v1  ;;  %v215_v8 = vpop.f32.mrb[1].mxu0 }
 0x11a   :  { %v446_v9 = vrot.slane %v445_v5, 2  ;;  %v216_v10 = vadd.f32 %v215_v8, %v141_v4 }
 0x11b   :  { %v285_v11 = vadd.f32 %v284_v50, %v214_v7 }
 0x11c   :  { %v447_v12 = vadd.f32 %v446_v9, %v445_v5  ;;  %v287_v13 = vadd.f32 %v286_v52, %v216_v10 }
 0x11d   :  { %v429_v14 = vmax.f32 %v285_v11, 0.0 }
 0x11e   :  { %v448_v15 = vrot.slane %v447_v12, 1  ;;  %v430_v16 = vmax.f32 %v287_v13, 0.0 }
 0x11f   :  { %v432_v17 = vrot.slane %v429_v14, 4 }
 0x120   :  { %v449_v18 = vadd.f32 %v448_v15, %v447_v12  ;;  %v438_v19 = vrot.slane %v430_v16, 4 }
 0x121   :  { %v433_v20 = vadd.f32 %v432_v17, %v429_v14 }
 0x122   :  { %v452_v21 = vadd.f32 2.220446e-16, %v449_v18  ;;  %v439_v22 = vadd.f32 %v438_v19, %v430_v16 }
 0x123   :  { %v434_v23 = vrot.slane %v433_v20, 2 }
 0x124   :  { %649 = vrcp.f32 %v452_v21  ;;  %v440_v24 = vrot.slane %v439_v22, 2 }
 0x125   :  { %v435_v25 = vadd.f32 %v434_v23, %v433_v20 }
 0x126   :  { %v441_v26 = vadd.f32 %v440_v24, %v439_v22 }
 0x127   :  { %v436_v27 = vrot.slane %v435_v25, 1 }
 0x128   :  { %v442_v28 = vrot.slane %v441_v26, 1 }
 0x129   :  { %v437_v29 = vadd.f32 %v436_v27, %v435_v25 }
 0x12a   :  { %v443_v30 = vadd.f32 %v442_v28, %v441_v26 }
 0x12b   :  { %v450_v31 = vadd.f32 2.220446e-16, %v437_v29 }
 0x12c   :  { %v451_v32 = vadd.f32 2.220446e-16, %v443_v30 }
 0x12d   :  { %651 = vrcp.f32 %v450_v31 }
 0x12e   :  { %v650_v33 = vpop.eup %649  ;;  %653 = vrcp.f32 %v451_v32 }
 0x12f   :  { %v458_v34 = vmul.f32 %v650_v33, %v431_v0 }
 0x131   :  { %461 = vst [vmem:[%s1067_s4 + $0x10] sm:$0xff] %v458_v34 }
 0x137   :  { %v652_v35 = vpop.eup %651 }
 0x138   :  { %v654_v36 = vpop.eup %653  ;;  %v456_v37 = vmul.f32 %v652_v35, %v429_v14 }
 0x139   :  { %v457_v38 = vmul.f32 %v654_v36, %v430_v16 }
 0x13a   :  { %459 = vst [vmem:[%s1067_s4] sm:$0xff] %v456_v37 }
 0x13b   :  { %460 = vst [vmem:[%s1067_s4 + $0x8] sm:$0xff] %v457_v38 }

</bundles_post_ra>
